<compile_context>
chip_gen: v6e
topology: v6e:2x2x1
jax: 0.10.0
libtpu: 0.0.40
codegen_flags: <defaults>
</compile_context>

<pallas_src>
import math
import functools

import jax
import jax.numpy as jnp
from jax.experimental import pallas as pl
from jax.experimental.pallas import tpu as pltpu

# ---------------- config ----------------
VOCAB = 256        # num_embeddings
D = 128            # embedding_dim
PAD_ID = 0         # pad_token_id
MAX_LEN = 64       # max_length
LN_EPS = 1e-5
EMB_SCALE = math.sqrt(D)     # scale_embeddings=True
TARGET_TILE_TOKENS = 512     # sweet spot per review (sweep 256-1024)


def _ceil_to(x: int, m: int) -> int:
    return ((x + m - 1) // m) * m


def _choose_seqs_per_tile(batch: int, seq_len: int, target_tokens: int) -> int:
    """Sequences per grid step.

    Every tile covers whole sequences (so the positional slab can be
    pre-tiled), the token/sublane dim of each block is a multiple of 8, and
    the grid keeps >=2 steps when the batch allows (v7x megacore).
    """
    unit = 8 // math.gcd(seq_len, 8)                    # min seqs for %8 tokens
    spt = max(unit, (max(1, target_tokens // seq_len) // unit) * unit)
    spt = min(spt, _ceil_to(batch, unit))               # don't over-pad the batch
    if batch >= 2 * unit:                               # keep >=2 grid steps
        spt = min(spt, max(unit, _ceil_to((batch + 1) // 2, unit)))
    return spt


# ---------------- Pallas kernel ----------------
def _std_embedding_kernel(ids_ref, table_ref, pos_slab_ref, gamma_ref,
                          beta_ref, out_ref):
    # ids_ref      : (TN, 1)     int32   token ids for this tile (whole seqs)
    # table_ref    : (VOCAB, D)  float32 embedding table (VMEM resident)
    # pos_slab_ref : (TN, D)     float32 sinusoidal rows pre-tiled per sequence
    # gamma_ref    : (1, D)      float32 LayerNorm weight
    # beta_ref     : (1, D)      float32 LayerNorm bias
    # out_ref      : (TN, D)     float32 LayerNorm(tok_emb*scale + pos_emb)
    ids = ids_ref[...]                                   # (TN, 1)
    tn = ids.shape[0]
    v = table_ref.shape[0]

    # Token embedding gather as one-hot matmul on the MXU.
    # sqrt(D) scale folded into the one-hot (exact: one nonzero per row).
    vocab_iota = jax.lax.broadcasted_iota(jnp.int32, (tn, v), 1)
    one_hot = jnp.where(vocab_iota == ids,
                        jnp.float32(EMB_SCALE), jnp.float32(0.0))   # (TN, V)
    x = jnp.dot(one_hot, table_ref[...],
                preferred_element_type=jnp.float32)      # (TN, D), scaled

    # mode='add_norm': positional term is a pre-tiled VMEM-resident slab
    # (tile covers whole sequences) -> single VPU add, no second gather.
    x = x + pos_slab_ref[...]

    # LayerNorm over the embedding dim (lanes), single-pass stats.
    inv_d = jnp.float32(1.0 / D)
    mean = jnp.sum(x, axis=-1, keepdims=True) * inv_d
    ex2 = jnp.sum(x * x, axis=-1, keepdims=True) * inv_d
    var = jnp.maximum(ex2 - mean * mean, jnp.float32(0.0))   # guard cancellation
    xhat = (x - mean) * jax.lax.rsqrt(var + jnp.float32(LN_EPS))
    out_ref[...] = xhat * gamma_ref[...] + beta_ref[...]


@functools.partial(jax.jit, static_argnames=("target_tile_tokens",))
def standard_embedding_forward(token_ids, emb_table, pos_table, ln_gamma,
                               ln_beta, *, target_tile_tokens=TARGET_TILE_TOKENS):
    """token_ids: (B, S) int32 -> (emb (B,S,D) f32, pos_emb (1,S,D) f32).

    pos_emb is returned un-broadcast (it is identical across the batch); the
    consumer can broadcast lazily.  This avoids writing a (B,S,D) array to HBM
    that would double the forward's HBM write traffic.
    """
    B, S = token_ids.shape
    if S > pos_table.shape[0]:
        raise ValueError(f"sequence length {S} exceeds max_length "
                         f"{pos_table.shape[0]}")

    spt = _choose_seqs_per_tile(B, S, target_tile_tokens)   # sequences / tile
    tn = spt * S                                             # tokens / tile
    B_pad = _ceil_to(B, spt)
    n_pad = B_pad * S

    # ---- glue (all tiny, computed once per call) ----
    ids = token_ids.astype(jnp.int32)
    if B_pad != B:
        ids = jnp.pad(ids, ((0, B_pad - B), (0, 0)), constant_values=PAD_ID)
    ids2 = ids.reshape(n_pad, 1)
    pos_slab = jnp.tile(pos_table[:S], (spt, 1))             # (TN, D)
    gamma2 = ln_gamma.reshape(1, D)
    beta2 = ln_beta.reshape(1, D)

    out_flat = pl.pallas_call(
        _std_embedding_kernel,
        out_shape=jax.ShapeDtypeStruct((n_pad, D), jnp.float32),
        grid=(n_pad // tn,),
        in_specs=[
            pl.BlockSpec((tn, 1), lambda i: (i, 0)),          # ids tile
            pl.BlockSpec((VOCAB, D), lambda i: (0, 0)),       # full emb table
            pl.BlockSpec((tn, D), lambda i: (0, 0)),          # pos slab (invariant)
            pl.BlockSpec((1, D), lambda i: (0, 0)),           # gamma
            pl.BlockSpec((1, D), lambda i: (0, 0)),           # beta
        ],
        out_specs=pl.BlockSpec((tn, D), lambda i: (i, 0)),
        compiler_params=pltpu.CompilerParams(
            dimension_semantics=("parallel",)),               # shards across TCs
    )(ids2, emb_table, pos_slab, gamma2, beta2)

    emb = out_flat[:B * S].reshape(B, S, D)
    pos_emb = pos_table[:S][None, :, :]                       # (1, S, D), lazy bcast
    # dropout p=0.0 -> identity; kwargs passthrough handled by caller
    return emb, pos_emb


# ---------------- parameter / buffer construction ----------------
def make_params(key):
    # TokenEmbedding with scale_embeddings=True: normal(0, D^-0.5), pad row = 0
    w = jax.random.normal(key, (VOCAB, D), dtype=jnp.float32) * (D ** -0.5)
    w = w.at[PAD_ID].set(0.0)

    # SinusoidalPositionalEmbedding buffer (MAX_LEN, D)
    position = jnp.arange(MAX_LEN, dtype=jnp.float32)[:, None]
    div_term = jnp.exp(jnp.arange(0, D, 2, dtype=jnp.float32)
                       * (-(math.log(10000.0) / D)))
    pe = jnp.zeros((MAX_LEN, D), dtype=jnp.float32)
    pe = pe.at[:, 0::2].set(jnp.sin(position * div_term))
    pe = pe.at[:, 1::2].set(jnp.cos(position * div_term))

    # LayerNorm defaults
    gamma = jnp.ones((D,), dtype=jnp.float32)
    beta = jnp.zeros((D,), dtype=jnp.float32)
    return w, pe, gamma, beta


def reference_forward(token_ids, emb_table, pos_table, gamma, beta):
    B, S = token_ids.shape
    tok = emb_table[token_ids] * EMB_SCALE                 # (B,S,D)
    pos = jnp.broadcast_to(pos_table[:S][None], (B, S, D))
    x = tok + pos
    mean = jnp.mean(x, axis=-1, keepdims=True)
    var = jnp.mean(jnp.square(x - mean), axis=-1, keepdims=True)
    out = (x - mean) * jax.lax.rsqrt(var + LN_EPS) * gamma + beta
    return out, pos


if __name__ == "__main__":
    key = jax.random.PRNGKey(0)
    k_w, k_ids1, k_ids2 = jax.random.split(key, 3)

    emb_table, pos_table, ln_gamma, ln_beta = make_params(k_w)

    # Case 1: full-length sequences; tile = whole sequences, 2 grid steps.
    B1, S1 = 4, 64
    ids1 = jax.random.randint(k_ids1, (B1, S1), 0, VOCAB, dtype=jnp.int32)
    ids1 = ids1.at[:, -1].set(PAD_ID)                      # include pad tokens
    emb1, pos1 = standard_embedding_forward(ids1, emb_table, pos_table,
                                            ln_gamma, ln_beta)
    jax.block_until_ready((emb1, pos1))
    ref_emb1, ref_pos1 = reference_forward(ids1, emb_table, pos_table,
                                           ln_gamma, ln_beta)
    assert emb1.shape == (B1, S1, D) and pos1.shape == (1, S1, D)
    assert jnp.allclose(emb1, ref_emb1, atol=5e-4, rtol=1e-4)
    assert jnp.allclose(jnp.broadcast_to(pos1, (B1, S1, D)), ref_pos1, atol=1e-6)

    # Case 2: ragged sequence length (S not a divisor of 8 -> batch-padded tile).
    B2, S2 = 2, 13
    ids2 = jax.random.randint(k_ids2, (B2, S2), 0, VOCAB, dtype=jnp.int32)
    ids2 = ids2.at[:, 0].set(PAD_ID)
    emb2, pos2 = standard_embedding_forward(ids2, emb_table, pos_table,
                                            ln_gamma, ln_beta)
    jax.block_until_ready((emb2, pos2))
    ref_emb2, ref_pos2 = reference_forward(ids2, emb_table, pos_table,
                                           ln_gamma, ln_beta)
    assert emb2.shape == (B2, S2, D) and pos2.shape == (1, S2, D)
    assert jnp.allclose(emb2, ref_emb2, atol=5e-4, rtol=1e-4)
    assert jnp.allclose(jnp.broadcast_to(pos2, (B2, S2, D)), ref_pos2, atol=1e-6)

    kwargs = {}  # forward() passes kwargs through unchanged (no grouping)
    print("KERNEL_OK")
</pallas_src>

<mosaic_0001>
module attributes {stable_mosaic.version = 11 : i64} {
  func.func @_std_embedding_kernel(%arg0: i32, %arg1: memref<128x1xi32, #tpu.memory_space<vmem>>, %arg2: memref<256x128xf32, #tpu.memory_space<vmem>>, %arg3: memref<128x128xf32, #tpu.memory_space<vmem>>, %arg4: memref<1x128xf32, #tpu.memory_space<vmem>>, %arg5: memref<1x128xf32, #tpu.memory_space<vmem>>, %arg6: memref<128x128xf32, #tpu.memory_space<vmem>>) attributes {dimension_semantics = [#tpu.dimension_semantics<parallel>], iteration_bounds = array<i64: 2>, scalar_prefetch = 0 : i64, scratch_operands = 0 : i64, tpu.core_type = #tpu.core_type<tc>, window_params = [{transform_indices = @transform_0, window_bounds = array<i64: 128, 1>}, {pipeline_mode = #tpu.pipeline_mode<synchronous>, transform_indices = @transform_1, window_bounds = array<i64: 256, 128>}, {pipeline_mode = #tpu.pipeline_mode<synchronous>, transform_indices = @transform_2, window_bounds = array<i64: 128, 128>}, {pipeline_mode = #tpu.pipeline_mode<synchronous>, transform_indices = @transform_3, window_bounds = array<i64: 1, 128>}, {pipeline_mode = #tpu.pipeline_mode<synchronous>, transform_indices = @transform_4, window_bounds = array<i64: 1, 128>}, {transform_indices = @transform_5, window_bounds = array<i64: 128, 128>}]} {
    %c0 = arith.constant 0 : index
    %c0_0 = arith.constant 0 : index
    %0 = vector.load %arg1[%c0, %c0_0] : memref<128x1xi32, #tpu.memory_space<vmem>>, vector<128x1xi32>
    %1 = tpu.iota {dimensions = array<i32: 1>} : vector<128x256xi32>
    %2 = vector.broadcast %0 : vector<128x1xi32> to vector<128x256xi32>
    %3 = arith.cmpi eq, %1, %2 : vector<128x256xi32>
    %cst = arith.constant 11.3137083 : f32
    %cst_1 = arith.constant 0.000000e+00 : f32
    %4 = vector.broadcast %cst : f32 to vector<128x256xf32>
    %5 = vector.broadcast %cst_1 : f32 to vector<128x256xf32>
    %6 = arith.select %3, %4, %5 : vector<128x256xi1>, vector<128x256xf32>
    %c0_2 = arith.constant 0 : index
    %c0_3 = arith.constant 0 : index
    %7 = vector.load %arg2[%c0_2, %c0_3] : memref<256x128xf32, #tpu.memory_space<vmem>>, vector<256x128xf32>
    %cst_4 = arith.constant dense<0.000000e+00> : vector<128x128xf32>
    %8 = tpu.matmul %6, %7, %cst_4 {dimension_numbers = #tpu.dot_dimension_numbers<[1], [0], [0], [1], [0, 0, 1, 1], [], []>} : vector<128x256xf32>, vector<256x128xf32>, vector<128x128xf32> -> vector<128x128xf32>
    %c0_5 = arith.constant 0 : index
    %c0_6 = arith.constant 0 : index
    %9 = vector.load %arg3[%c0_5, %c0_6] : memref<128x128xf32, #tpu.memory_space<vmem>>, vector<128x128xf32>
    %10 = arith.addf %8, %9 : vector<128x128xf32>
    %cst_7 = arith.constant dense<0.000000e+00> : vector<128xf32>
    %11 = vector.multi_reduction <add>, %10, %cst_7 [1] : vector<128x128xf32> to vector<128xf32>
    %12 = vector.shape_cast %11 : vector<128xf32> to vector<128x1xf32>
    %cst_8 = arith.constant 7.812500e-03 : f32
    %13 = vector.broadcast %cst_8 : f32 to vector<128x1xf32>
    %14 = arith.mulf %12, %13 : vector<128x1xf32>
    %15 = arith.mulf %10, %10 : vector<128x128xf32>
    %cst_9 = arith.constant dense<0.000000e+00> : vector<128xf32>
    %16 = vector.multi_reduction <add>, %15, %cst_9 [1] : vector<128x128xf32> to vector<128xf32>
    %17 = vector.shape_cast %16 : vector<128xf32> to vector<128x1xf32>
    %cst_10 = arith.constant 7.812500e-03 : f32
    %18 = vector.broadcast %cst_10 : f32 to vector<128x1xf32>
    %19 = arith.mulf %17, %18 : vector<128x1xf32>
    %20 = arith.mulf %14, %14 : vector<128x1xf32>
    %21 = arith.subf %19, %20 : vector<128x1xf32>
    %cst_11 = arith.constant 0.000000e+00 : f32
    %22 = vector.broadcast %cst_11 : f32 to vector<128x1xf32>
    %23 = arith.maximumf %21, %22 : vector<128x1xf32>
    %24 = vector.broadcast %14 : vector<128x1xf32> to vector<128x128xf32>
    %25 = arith.subf %10, %24 : vector<128x128xf32>
    %cst_12 = arith.constant 9.99999974E-6 : f32
    %26 = vector.broadcast %cst_12 : f32 to vector<128x1xf32>
    %27 = arith.addf %23, %26 : vector<128x1xf32>
    %28 = math.rsqrt %27 : vector<128x1xf32>
    %29 = vector.broadcast %28 : vector<128x1xf32> to vector<128x128xf32>
    %30 = arith.mulf %25, %29 : vector<128x128xf32>
    %c0_13 = arith.constant 0 : index
    %c0_14 = arith.constant 0 : index
    %31 = vector.load %arg4[%c0_13, %c0_14] : memref<1x128xf32, #tpu.memory_space<vmem>>, vector<1x128xf32>
    %32 = vector.broadcast %31 : vector<1x128xf32> to vector<128x128xf32>
    %33 = arith.mulf %30, %32 : vector<128x128xf32>
    %c0_15 = arith.constant 0 : index
    %c0_16 = arith.constant 0 : index
    %34 = vector.load %arg5[%c0_15, %c0_16] : memref<1x128xf32, #tpu.memory_space<vmem>>, vector<1x128xf32>
    %35 = vector.broadcast %34 : vector<1x128xf32> to vector<128x128xf32>
    %36 = arith.addf %33, %35 : vector<128x128xf32>
    %c0_17 = arith.constant 0 : index
    %c0_18 = arith.constant 0 : index
    %37 = vector.load %arg6[%c0_17, %c0_18] : memref<128x128xf32, #tpu.memory_space<vmem>>, vector<128x128xf32>
    tpu.vector_store %arg6[%c0_17, %c0_18], %36 {strides = array<i32>} : memref<128x128xf32, #tpu.memory_space<vmem>>, vector<128x128xf32>,
    return
  }
  func.func @transform_0(%arg0: i32) -> (i32, i32) {
    %c0_i32 = arith.constant 0 : i32
    %c0_i32_0 = arith.constant 0 : i32
    return %arg0, %c0_i32 : i32, i32
  }
  func.func @transform_1(%arg0: i32) -> (i32, i32) {
    %c0_i32 = arith.constant 0 : i32
    %c0_i32_0 = arith.constant 0 : i32
    %c0_i32_1 = arith.constant 0 : i32
    return %c0_i32, %c0_i32_0 : i32, i32
  }
  func.func @transform_2(%arg0: i32) -> (i32, i32) {
    %c0_i32 = arith.constant 0 : i32
    %c0_i32_0 = arith.constant 0 : i32
    %c0_i32_1 = arith.constant 0 : i32
    return %c0_i32, %c0_i32_0 : i32, i32
  }
  func.func @transform_3(%arg0: i32) -> (i32, i32) {
    %c0_i32 = arith.constant 0 : i32
    %c0_i32_0 = arith.constant 0 : i32
    %c0_i32_1 = arith.constant 0 : i32
    return %c0_i32, %c0_i32_0 : i32, i32
  }
  func.func @transform_4(%arg0: i32) -> (i32, i32) {
    %c0_i32 = arith.constant 0 : i32
    %c0_i32_0 = arith.constant 0 : i32
    %c0_i32_1 = arith.constant 0 : i32
    return %c0_i32, %c0_i32_0 : i32, i32
  }
  func.func @transform_5(%arg0: i32) -> (i32, i32) {
    %c0_i32 = arith.constant 0 : i32
    %c0_i32_0 = arith.constant 0 : i32
    return %arg0, %c0_i32 : i32, i32
  }
}

</mosaic_0001>

<bundles_post_ra>
// kernel: standard_embedding_forward.1
= control target key start
LH: loop header
LB: loop body
LE: loop exit
PB: predicated region body
PF: predicated region fallthrough
CT: control target
= control target key end

     0   :  { %10 = vsyncpa [#allocation3], 0  ;;  %s1808_s0 = inlined_call_operand.vmem [shape: s32[256,1], index: 0, kind: input, shape index: {}]   ;;  %s1809_s1 = inlined_call_operand.vmem [shape: f32[256,128], index: 1, kind: input, shape index: {}]   ;;  %s1810_s2 = inlined_call_operand.vmem [shape: f32[128,128], index: 2, kind: input, shape index: {}]   ;;  %s1811_s3 = inlined_call_operand.vmem [shape: f32[1,128], index: 3, kind: input, shape index: {}]   ;;  %s1812_s4 = inlined_call_operand.vmem [shape: f32[1,128], index: 4, kind: input, shape index: {}]   ;;  %s1813_s5 = inlined_call_operand.hbm [shape: f32[256,128], index: 5, kind: output, shape index: {}]  }
   0x1   :  { %12 = vsyncpa [#allocation3 + $0x1], 0  ;;  %s1245_s18 = smov 0   ;;  %s1247_s19 = smov 0  }
   0x2   :  { %s1249_s20 = smov 0   ;;  %s1251_s21 = smov 0  }
   0x3 LB: > { %s1266_s22 = sadd.s32 4294967295, %s1208_s21   ;;  %s912_s23 = sadd.s32 4294967294, %s1208_s21   ;;  %s1208_s21 = sphi %s1251_s21, %s1819_s21   ;;  %s1204_s20 = sphi %s1249_s20, %s1818_s20   ;;  %s1200_s19 = sphi %s1247_s19, %s1817_s19   ;;  %s1196_s18 = sphi %s1245_s18, %s1816_s18  }
   0x4   : > { %s1270_s24 = sadd.s32 1, %s1208_s21   ;;  %s135_s25 = sadd.s32 1, %s1204_s20 }
   0x5   : > { %s132_s26 = ssub.s32 %s1208_s21, %s1270_s24  ;;  %p145_p0 = scmp.ne.s32.totalorder %s1204_s20, %s1200_s19 }
   0x6   : > { %p133_p1 = scmp.eq.s32.totalorder %s132_s26, 0  ;;  %p146_p2 = scmp.eq.s32.totalorder %s1266_s22, 1 }
   0x7   : > { %p151_p3 = scmp.ne.s32.totalorder %s1200_s19, %s1196_s18  ;;  %p152_p4 = scmp.eq.s32.totalorder %s912_s23, 1 }
   0x8   : > { %s1281_s27 = scalar_select %p133_p1, %s1204_s20, %s135_s25  }
   0x9   : > { %p1283_p5 = por %p146_p2, %p145_p0  ;;  %p1287_p6 = por %p152_p4, %p151_p3 }
   0xa   : > { %p915_p7 = scmp.ge.s32.totalorder %s1208_s21, 1  ;;  %p191_p8 = scmp.lt.s32.totalorder %s1208_s21, 3 }
   0xc   : > { %p192_p9 = pnand %p915_p7, %p191_p8 }
   0xd   : > { %s917_s30 = sshll.u32 (!%p192_p9), %s1266_s22, 4  ;;  %s216_s12 = sand.u32 (!%p192_p9), 1, %s1200_s19  }
   0xe   : > { %195 = sbr.rel (%p192_p9) target bundleno = 601 (0x259), region = 40  ;;  %p220_p10 = scmp.lt.s32.totalorder (!%p192_p9), %s917_s30, 31 }
   0xf   : > { %s916_s15 = sshll.u32 (!%p192_p9), %s216_s12, 7  ;;  %s958_s25 = sshll.u32 (!%p192_p9), %s1266_s22, 11 }
  0x10   : > { %s1212_s9 = smov (!%p192_p9), [#allocation2]  }
  0x11   : > { %s1152_s10 = sshll.u32 (!%p192_p9), %s1212_s9, 4  ;;  %s1153_s10 = int_to_ptr.vmem [resolvable:$false] %s1152_s10 }
  0x12   : > { %s1154_s11 = scalar_lea.vmem (!%p192_p9), %s1153_s10, 4096 }
  0x13   : > { %v388_v0 = vld [vmem:[%s1809_s1 + $0xf8] sm:$0xff]  ;;  %v1210_v2 = vmov 0   ;;  %v387_v3 = vld [vmem:[%s1809_s1 + $0xf0] sm:$0xff]  ;;  %s1821_s30 = smov (!%p220_p10, %s917_s30), 31  ;;  %v386_v5 = vld [vmem:[%s1809_s1 + $0xe8] sm:$0xff]  ;;  %v242_v49 = vlaneseq }
  0x14   : > { %v372_v1 = vld [vmem:[%s1809_s1 + $0x78] sm:$0xff]  ;;  %1115 = vset.pattern.permute.xlu1 %v1210_v2  ;;  %1114 = vset.pattern.permute.xlu0 %v1210_v2  ;;  %v371_v4 = vld [vmem:[%s1809_s1 + $0x70] sm:$0xff]  ;;  %v370_v6 = vld [vmem:[%s1809_s1 + $0x68] sm:$0xff]  ;;  %s918_s23 = sshll.u32 %s1821_s30, 3  ;;  %v1211_v54 = vmov 11.313708   ;;  %s1760_s30 = scalar_lea.hbm %s1813_s5, %s958_s25 }
  0x15   : > { %959 = vmatprep.subr.mxu0 %v388_v0  ;;  %1039 = vmatprep.subr.mxu1 %v388_v0  ;;  %s1315_s6 = scalar_lea.vmem %s1808_s0, %s918_s23  ;;  %v385_v7 = vld [vmem:[%s1809_s1 + $0xe0] sm:$0xff]  ;;  %v384_v11 = vld [vmem:[%s1809_s1 + $0xd8] sm:$0xff]  ;;  %v383_v15 = vld [vmem:[%s1809_s1 + $0xd0] sm:$0xff]  ;;  %v1411_v50 = vand.u32 127, %v242_v49  ;;  %s1654_s23 = scalar_lea.vmem [#allocation2], %s916_s15 }
  0x16   : > { %960 = vmatpush3.msra.mxu0 %v372_v1  ;;  %1055 = vmatpush3.msra.mxu1 %v372_v1  ;;  %v227_v8 = vld [vmem:[%s1315_s6 + $0x8] sm:$0xff]  ;;  %v226_v9 = vld [vmem:[%s1315_s6] sm:$0xff]  ;;  %v368_v14 = vld [vmem:[%s1809_s1 + $0x58] sm:$0xff]  ;;  %s850_s26 = sshll.u32 %s1654_s23, 4  ;;  %s1762_s26 = int_to_ptr.vmem [resolvable:$true] %s850_s26 }
  0x17   : > { %961 = vmatprep.subr.mxu0 %v387_v3  ;;  %1040 = vmatprep.subr.mxu1 %v387_v3  ;;  %v369_v10 = vld [vmem:[%s1809_s1 + $0x60] sm:$0xff]  ;;  %v235_v12 = vld [vmem:[%s1315_s6 + $0x48] sm:$0xff]  ;;  %v367_v16 = vld [vmem:[%s1809_s1 + $0x50] sm:$0xff]  ;;  %v1414_v51 = vadd.s32 128, %v1411_v50  ;;  %s1148_s22 = scalar_lea.vmem %s1762_s26, 2048  ;;  %p1155_p0 = scmp.lt.s32.totalorder %s1762_s26, %s1153_s10 }
  0x18   : > { %962 = vmatpush3.msra.mxu0 %v371_v4  ;;  %1056 = vmatpush3.msra.mxu1 %v371_v4  ;;  %v234_v13 = vld [vmem:[%s1315_s6 + $0x40] sm:$0xff]  ;;  %v236_v17 = vld [vmem:[%s1315_s6 + $0x50] sm:$0xff]  ;;  %v382_v19 = vld [vmem:[%s1809_s1 + $0xc8] sm:$0xff]  ;;  %p1149_p11 = scmp.ne.s32.totalorder %s1762_s26, %s1148_s22  ;;  %p1156_p1 = scmp.lt.s32.totalorder %s1154_s11, %s1148_s22 }
  0x19   : > { %963 = vmatprep.subr.mxu0 %v386_v5  ;;  %1041 = vmatprep.subr.mxu1 %v386_v5  ;;  %v228_v18 = vld [vmem:[%s1315_s6 + $0x10] sm:$0xff]  ;;  %v366_v20 = vld [vmem:[%s1809_s1 + $0x48] sm:$0xff]  ;;  %v381_v21 = vld [vmem:[%s1809_s1 + $0xc0] sm:$0xff] }
  0x1a   : > { %964 = vmatpush3.msra.mxu0 %v370_v6  ;;  %1057 = vmatpush3.msra.mxu1 %v370_v6  ;;  %v237_v22 = vld [vmem:[%s1315_s6 + $0x58] sm:$0xff]  ;;  %v365_v24 = vld [vmem:[%s1809_s1 + $0x40] sm:$0xff]  ;;  %v379_v29 = vld [vmem:[%s1809_s1 + $0xb0] sm:$0xff]  ;;  %p1150_p12 = pnand %p1149_p11, %p1283_p5  ;;  %p1157_p2 = por %p1156_p1, %p1155_p0 }
  0x1b   : > { %249 = vperm.xlu1 %1115, %v227_v8   ;;  %246 = vperm.xlu0 %1114, %v226_v9   ;;  %v229_v23 = vld [vmem:[%s1315_s6 + $0x18] sm:$0xff]  ;;  %v238_v27 = vld [vmem:[%s1315_s6 + $0x60] sm:$0xff]  ;;  %v363_v30 = vld [vmem:[%s1809_s1 + $0x30] sm:$0xff] }
  0x1c   : > { %965 = vmatprep.subr.mxu0 %v385_v7  ;;  %1042 = vmatprep.subr.mxu1 %v385_v7  ;;  %v380_v25 = vld [vmem:[%s1809_s1 + $0xb8] sm:$0xff]  ;;  %v230_v28 = vld [vmem:[%s1315_s6 + $0x20] sm:$0xff]  ;;  %v378_v31 = vld [vmem:[%s1809_s1 + $0xa8] sm:$0xff]  ;;  %p1151_p13 = pneg %p1150_p12 }
  0x1d   : > { %966 = vmatpush3.msra.mxu0 %v369_v10  ;;  %1058 = vmatpush3.msra.mxu1 %v369_v10  ;;  %v364_v26 = vld [vmem:[%s1809_s1 + $0x38] sm:$0xff]  ;;  %v239_v32 = vld [vmem:[%s1315_s6 + $0x68] sm:$0xff]  ;;  %v377_v35 = vld [vmem:[%s1809_s1 + $0xa0] sm:$0xff] }
  0x1e   : > { %967 = vmatprep.subr.mxu0 %v384_v11  ;;  %1043 = vmatprep.subr.mxu1 %v384_v11  ;;  %v231_v33 = vld [vmem:[%s1315_s6 + $0x28] sm:$0xff]  ;;  %v361_v36 = vld [vmem:[%s1809_s1 + $0x20] sm:$0xff]  ;;  %v240_v37 = vld [vmem:[%s1315_s6 + $0x70] sm:$0xff]  ;;  %p1158_p3 = pnand %p1157_p2, %p1151_p13 }
  0x1f   : > { %273 = vperm.xlu1 %1115, %v235_v12   ;;  %270 = vperm.xlu0 %1114, %v234_v13   ;;  %v362_v34 = vld [vmem:[%s1809_s1 + $0x28] sm:$0xff]  ;;  %v232_v38 = vld [vmem:[%s1315_s6 + $0x30] sm:$0xff]  ;;  %v376_v39 = vld [vmem:[%s1809_s1 + $0x98] sm:$0xff] }
  0x20   : > { %968 = vmatpush3.msra.mxu0 %v368_v14  ;;  %1059 = vmatpush3.msra.mxu1 %v368_v14  ;;  %v360_v40 = vld [vmem:[%s1809_s1 + $0x18] sm:$0xff]  ;;  %v375_v41 = vld [vmem:[%s1809_s1 + $0x90] sm:$0xff]  ;;  %v374_v45 = vld [vmem:[%s1809_s1 + $0x88] sm:$0xff] }
  0x21   : > { %969 = vmatprep.subr.mxu0 %v383_v15  ;;  %1044 = vmatprep.subr.mxu1 %v383_v15  ;;  %v241_v42 = vld [vmem:[%s1315_s6 + $0x78] sm:$0xff]  ;;  %v359_v44 = vld [vmem:[%s1809_s1 + $0x10] sm:$0xff]  ;;  %v358_v46 = vld [vmem:[%s1809_s1 + $0x8] sm:$0xff] }
  0x22   : > { %970 = vmatpush3.msra.mxu0 %v367_v16  ;;  %1060 = vmatpush3.msra.mxu1 %v367_v16  ;;  %v233_v43 = vld [vmem:[%s1315_s6 + $0x38] sm:$0xff]  ;;  %v373_v47 = vld [vmem:[%s1809_s1 + $0x80] sm:$0xff]  ;;  %s1768_s6 = scalar_lea.sflag [#allocation3], %s216_s12 }
  0x23   : > { %276 = vperm.xlu1 %1115, %v236_v17   ;;  %252 = vperm.xlu0 %1114, %v228_v18   ;;  %v357_v48 = vld [vmem:[%s1809_s1] sm:$0xff] }
  0x24   : > { %971 = vmatprep.subr.mxu0 %v382_v19  ;;  %1045 = vmatprep.subr.mxu1 %v382_v19  ;;  %v389_v6 = vld [vmem:[%s1810_s2] sm:$0xff]  ;;  %v390_v19 = vld [vmem:[%s1810_s2 + $0x8] sm:$0xff] }
  0x25   : > { %972 = vmatpush3.msra.mxu0 %v366_v20  ;;  %1061 = vmatpush3.msra.mxu1 %v366_v20  ;;  %v397_v13 = vld [vmem:[%s1810_s2 + $0x40] sm:$0xff] }
  0x26   : > { %973 = vmatprep.subr.mxu0 %v381_v21  ;;  %1046 = vmatprep.subr.mxu1 %v381_v21  ;;  %v398_v21 = vld [vmem:[%s1810_s2 + $0x48] sm:$0xff] }
  0x27   : > { %279 = vperm.xlu1 %1115, %v237_v22   ;;  %255 = vperm.xlu0 %1114, %v229_v23  }
  0x28   : > { %974 = vmatpush3.msra.mxu0 %v365_v24  ;;  %1062 = vmatpush3.msra.mxu1 %v365_v24 }
  0x29   : > { %975 = vmatprep.subr.mxu0 %v380_v25  ;;  %1047 = vmatprep.subr.mxu1 %v380_v25 }
  0x2a   : > { %976 = vmatpush3.msra.mxu0 %v364_v26  ;;  %1063 = vmatpush3.msra.mxu1 %v364_v26 }
  0x2b   : > { %282 = vperm.xlu1 %1115, %v238_v27   ;;  %258 = vperm.xlu0 %1114, %v230_v28  }
  0x2c   : > { %977 = vmatprep.subr.mxu0 %v379_v29  ;;  %1048 = vmatprep.subr.mxu1 %v379_v29 }
  0x2d   : > { %978 = vmatpush3.msra.mxu0 %v363_v30  ;;  %1064 = vmatpush3.msra.mxu1 %v363_v30 }
  0x2e   : > { %979 = vmatprep.subr.mxu0 %v378_v31  ;;  %1049 = vmatprep.subr.mxu1 %v378_v31 }
  0x2f   : > { %285 = vperm.xlu1 %1115, %v239_v32   ;;  %261 = vperm.xlu0 %1114, %v231_v33  }
  0x30   : > { %980 = vmatpush3.msra.mxu0 %v362_v34  ;;  %1065 = vmatpush3.msra.mxu1 %v362_v34 }
  0x31   : > { %981 = vmatprep.subr.mxu0 %v377_v35  ;;  %1050 = vmatprep.subr.mxu1 %v377_v35 }
  0x32   : > { %982 = vmatpush3.msra.mxu0 %v361_v36  ;;  %1066 = vmatpush3.msra.mxu1 %v361_v36  ;;  %v391_v36 = vld [vmem:[%s1810_s2 + $0x10] sm:$0xff] }
  0x33   : > { %288 = vperm.xlu1 %1115, %v240_v37   ;;  %264 = vperm.xlu0 %1114, %v232_v38   ;;  %v399_v38 = vld [vmem:[%s1810_s2 + $0x50] sm:$0xff] }
  0x34   : > { %983 = vmatprep.subr.mxu0 %v376_v39  ;;  %1051 = vmatprep.subr.mxu1 %v376_v39 }
  0x35   : > { %984 = vmatpush3.msra.mxu0 %v360_v40  ;;  %1067 = vmatpush3.msra.mxu1 %v360_v40 }
  0x36   : > { %985 = vmatprep.subr.mxu0 %v375_v41  ;;  %1052 = vmatprep.subr.mxu1 %v375_v41 }
  0x37   : > { %291 = vperm.xlu1 %1115, %v241_v42   ;;  %267 = vperm.xlu0 %1114, %v233_v43   ;;  %v392_v43 = vld [vmem:[%s1810_s2 + $0x18] sm:$0xff] }
  0x38   : > { %986 = vmatpush3.msra.mxu0 %v359_v44  ;;  %1068 = vmatpush3.msra.mxu1 %v359_v44 }
  0x39   : > { %987 = vmatprep.subr.mxu0 %v374_v45  ;;  %1053 = vmatprep.subr.mxu1 %v374_v45 }
  0x3a   : > { %988 = vmatpush3.msra.mxu0 %v358_v46  ;;  %1069 = vmatpush3.msra.mxu1 %v358_v46 }
  0x3b   : > { %989 = vmatprep.subr.mxu0 %v373_v47  ;;  %1054 = vmatprep.subr.mxu1 %v373_v47 }
  0x3c   : > { %990 = vmatpush3.msra.mxu0 %v357_v48  ;;  %1070 = vmatpush3.msra.mxu1 %v357_v48 }
  0x96   : > { %v250_v52 = vpop.permute.xlu1 %249  ;;  %v247_v53 = vpop.permute.xlu0 %246 }
  0x97   : > { %vm296_vm0 = vcmp.eq.s32.totalorder %v1414_v51, %v250_v52  ;;  %vm293_vm1 = vcmp.eq.s32.totalorder %v1411_v50, %v247_v53  ;;  %vm294_vm2 = vcmp.eq.s32.totalorder %v1414_v51, %v247_v53  ;;  %vm295_vm3 = vcmp.eq.s32.totalorder %v1411_v50, %v250_v52 }
  0x98   : > { %919 = vmatprep.mubr.msk.f32.mxu0 %vm294_vm2, %v1211_v54 }
  0x99   : > { %920 = vmatmul.mubr.msk.f32.vlgmr.msra.gmra.mxu0 %vm293_vm1, %v1211_v54 }
  0x9a   : > { %v274_v55 = vpop.permute.xlu1 %273  ;;  %v271_v56 = vpop.permute.xlu0 %270  ;;  %921 = vmatprep.mubr.msk.f32.mxu0 %vm296_vm0, %v1211_v54 }
  0x9b   : > { %vm309_vm4 = vcmp.eq.s32.totalorder %v1411_v50, %v271_v56  ;;  %vm310_vm5 = vcmp.eq.s32.totalorder %v1414_v51, %v271_v56  ;;  %vm312_vm6 = vcmp.eq.s32.totalorder %v1414_v51, %v274_v55  ;;  %vm311_vm9 = vcmp.eq.s32.totalorder %v1411_v50, %v274_v55  ;;  %v393_v55 = vld [vmem:[%s1810_s2 + $0x20] sm:$0xff] }
  0x9c   : > { %935 = vmatprep.mubr.msk.f32.mxu1 %vm310_vm5, %v1211_v54 }
  0x9d   : > { %922 = vmatmul.mubr.msk.f32.gmra.mxu0 %vm295_vm3, %v1211_v54  ;;  %936 = vmatmul.mubr.msk.f32.vlgmr.msra.gmra.mxu1 %vm309_vm4, %v1211_v54 }
  0x9e   : > { %v277_v57 = vpop.permute.xlu1 %276  ;;  %937 = vmatprep.mubr.msk.f32.mxu1 %vm312_vm6, %v1211_v54  ;;  %v253_v58 = vpop.permute.xlu0 %252 }
  0x9f   : > { %vm297_vm7 = vcmp.eq.s32.totalorder %v1411_v50, %v253_v58  ;;  %vm298_vm8 = vcmp.eq.s32.totalorder %v1414_v51, %v253_v58  ;;  %vm314_vm10 = vcmp.eq.s32.totalorder %v1414_v51, %v277_v57  ;;  %vm313_vm13 = vcmp.eq.s32.totalorder %v1411_v50, %v277_v57 }
  0xa0   : > { %923 = vmatprep.mubr.msk.f32.mxu0 %vm298_vm8, %v1211_v54 }
  0xa1   : > { %924 = vmatmul.mubr.msk.f32.gmra.mxu0 %vm297_vm7, %v1211_v54  ;;  %938 = vmatmul.mubr.msk.f32.gmra.mxu1 %vm311_vm9, %v1211_v54 }
  0xa2   : > { %v280_v59 = vpop.permute.xlu1 %279  ;;  %939 = vmatprep.mubr.msk.f32.mxu1 %vm314_vm10, %v1211_v54  ;;  %v256_v60 = vpop.permute.xlu0 %255 }
  0xa3   : > { %vm299_vm11 = vcmp.eq.s32.totalorder %v1411_v50, %v256_v60  ;;  %vm300_vm12 = vcmp.eq.s32.totalorder %v1414_v51, %v256_v60  ;;  %vm316_vm14 = vcmp.eq.s32.totalorder %v1414_v51, %v280_v59  ;;  %vm315_vm1 = vcmp.eq.s32.totalorder %v1411_v50, %v280_v59 }
  0xa4   : > { %925 = vmatprep.mubr.msk.f32.mxu0 %vm300_vm12, %v1211_v54 }
  0xa5   : > { %926 = vmatmul.mubr.msk.f32.gmra.mxu0 %vm299_vm11, %v1211_v54  ;;  %940 = vmatmul.mubr.msk.f32.gmra.mxu1 %vm313_vm13, %v1211_v54 }
  0xa6   : > { %v283_v61 = vpop.permute.xlu1 %282  ;;  %941 = vmatprep.mubr.msk.f32.mxu1 %vm316_vm14, %v1211_v54  ;;  %v259_v62 = vpop.permute.xlu0 %258 }
  0xa7   : > { %vm301_vm15 = vcmp.eq.s32.totalorder %v1411_v50, %v259_v62  ;;  %vm302_vm0 = vcmp.eq.s32.totalorder %v1414_v51, %v259_v62  ;;  %vm318_vm2 = vcmp.eq.s32.totalorder %v1414_v51, %v283_v61  ;;  %vm317_vm5 = vcmp.eq.s32.totalorder %v1411_v50, %v283_v61  ;;  %v401_v62 = vld [vmem:[%s1810_s2 + $0x60] sm:$0xff] }
  0xa8   : > { %927 = vmatprep.mubr.msk.f32.mxu0 %vm302_vm0, %v1211_v54 }
  0xa9   : > { %928 = vmatmul.mubr.msk.f32.gmra.mxu0 %vm301_vm15, %v1211_v54  ;;  %942 = vmatmul.mubr.msk.f32.gmra.mxu1 %vm315_vm1, %v1211_v54 }
  0xaa   : > { %v286_v63 = vpop.permute.xlu1 %285  ;;  %943 = vmatprep.mubr.msk.f32.mxu1 %vm318_vm2, %v1211_v54  ;;  %v262_v0 = vpop.permute.xlu0 %261 }
  0xab   : > { %vm303_vm3 = vcmp.eq.s32.totalorder %v1411_v50, %v262_v0  ;;  %vm304_vm4 = vcmp.eq.s32.totalorder %v1414_v51, %v262_v0  ;;  %vm320_vm6 = vcmp.eq.s32.totalorder %v1414_v51, %v286_v63  ;;  %vm319_vm9 = vcmp.eq.s32.totalorder %v1411_v50, %v286_v63 }
  0xac   : > { %929 = vmatprep.mubr.msk.f32.mxu0 %vm304_vm4, %v1211_v54 }
  0xad   : > { %930 = vmatmul.mubr.msk.f32.gmra.mxu0 %vm303_vm3, %v1211_v54  ;;  %944 = vmatmul.mubr.msk.f32.gmra.mxu1 %vm317_vm5, %v1211_v54 }
  0xae   : > { %v289_v1 = vpop.permute.xlu1 %288  ;;  %945 = vmatprep.mubr.msk.f32.mxu1 %vm320_vm6, %v1211_v54  ;;  %v265_v2 = vpop.permute.xlu0 %264 }
  0xaf   : > { %vm305_vm7 = vcmp.eq.s32.totalorder %v1411_v50, %v265_v2  ;;  %vm306_vm8 = vcmp.eq.s32.totalorder %v1414_v51, %v265_v2  ;;  %vm322_vm10 = vcmp.eq.s32.totalorder %v1414_v51, %v289_v1  ;;  %vm321_vm13 = vcmp.eq.s32.totalorder %v1411_v50, %v289_v1 }
  0xb0   : > { %931 = vmatprep.mubr.msk.f32.mxu0 %vm306_vm8, %v1211_v54 }
  0xb1   : > { %932 = vmatmul.mubr.msk.f32.gmra.mxu0 %vm305_vm7, %v1211_v54  ;;  %946 = vmatmul.mubr.msk.f32.gmra.mxu1 %vm319_vm9, %v1211_v54 }
  0xb2   : > { %v292_v3 = vpop.permute.xlu1 %291  ;;  %947 = vmatprep.mubr.msk.f32.mxu1 %vm322_vm10, %v1211_v54  ;;  %v268_v4 = vpop.permute.xlu0 %267 }
  0xb3   : > { %vm307_vm11 = vcmp.eq.s32.totalorder %v1411_v50, %v268_v4  ;;  %vm308_vm12 = vcmp.eq.s32.totalorder %v1414_v51, %v268_v4  ;;  %vm324_vm14 = vcmp.eq.s32.totalorder %v1414_v51, %v292_v3  ;;  %vm323_vm15 = vcmp.eq.s32.totalorder %v1411_v50, %v292_v3  ;;  %v400_v50 = vld [vmem:[%s1810_s2 + $0x58] sm:$0xff]  ;;  %v394_v3 = vld [vmem:[%s1810_s2 + $0x28] sm:$0xff] }
  0xb4   : > { %933 = vmatprep.mubr.msk.f32.mxu0 %vm308_vm12, %v1211_v54 }
  0xb5   : > { %934 = vmatmul.mubr.msk.f32.gmra.mxu0 %vm307_vm11, %v1211_v54  ;;  %948 = vmatmul.mubr.msk.f32.gmra.mxu1 %vm321_vm13, %v1211_v54 }
  0xb6   : > { %949 = vmatprep.mubr.msk.f32.mxu1 %vm324_vm14, %v1211_v54 }
  0xb9   : > { %950 = vmatmul.mubr.msk.f32.gmra.mxu1 %vm323_vm15, %v1211_v54 }
 0x159   : > { %v991_v5 = vpop.f32.mrf.mxu0 }
 0x15b   : > { %v992_v7 = vpop.f32.mrf.mxu0 }
 0x15c   : > { %v993_v8 = vadd.f32 %v992_v7, %v991_v5 }
 0x15d   : > { %v994_v9 = vpop.f32.mrf.mxu0  ;;  %v1015_v10 = vpop.f32.mrf.mxu1 }
 0x15e   : > { %v1483_v11 = vadd.f32 %v993_v8, %v389_v6 }
 0x15f   : > { %v995_v12 = vpop.f32.mrf.mxu0  ;;  %v1016_v14 = vpop.f32.mrf.mxu1 }
 0x160   : > { %v1017_v15 = vadd.f32 %v1016_v14, %v1015_v10  ;;  %550 = vadd.xlane.f32.xlu0 %v1483_v11  ;;  %v996_v17 = vadd.f32 %v995_v12, %v994_v9  ;;  %v598_v26 = vmul.f32 %v1483_v11, %v1483_v11  ;;  %v402_v10 = vld [vmem:[%s1810_s2 + $0x68] sm:$0xff] }
 0x161   : > { %v1018_v16 = vpop.f32.mrf.mxu1  ;;  %v997_v20 = vpop.f32.mrf.mxu0 }
 0x162   : > { %v1489_v18 = vadd.f32 %v1017_v15, %v397_v13  ;;  %v1498_v24 = vadd.f32 %v996_v17, %v390_v19 }
 0x163   : > { %v1019_v22 = vpop.f32.mrf.mxu1  ;;  %v998_v27 = vpop.f32.mrf.mxu0 }
 0x164   : > { %v1020_v23 = vadd.f32 %v1019_v22, %v1018_v16  ;;  %566 = vadd.xlane.f32.xlu1 %v1489_v18  ;;  %v599_v29 = vmul.f32 %v1498_v24, %v1498_v24  ;;  %v606_v30 = vmul.f32 %v1489_v18, %v1489_v18  ;;  %v999_v33 = vadd.f32 %v998_v27, %v997_v20  ;;  %v395_v16 = vld [vmem:[%s1810_s2 + $0x30] sm:$0xff] }
 0x165   : > { %v1021_v28 = vpop.f32.mrf.mxu1  ;;  %v1000_v31 = vpop.f32.mrf.mxu0 }
 0x166   : > { %v1500_v25 = vadd.f32 %v1020_v23, %v398_v21  ;;  %v1518_v40 = vadd.f32 %v999_v33, %v391_v36  ;;  %v404_v36 = vld [vmem:[%s1810_s2 + $0x78] sm:$0xff] }
 0x167   : > { %v1022_v32 = vpop.f32.mrf.mxu1  ;;  %v1001_v37 = vpop.f32.mrf.mxu0 }
 0x168   : > { %568 = vadd.xlane.f32.xlu0 %v1500_v25  ;;  %614 = vadd.xlane.f32.xlu1 %v598_v26  ;;  %v1023_v34 = vadd.f32 %v1022_v32, %v1021_v28  ;;  %v607_v35 = vmul.f32 %v1500_v25, %v1500_v25  ;;  %v1002_v41 = vadd.f32 %v1001_v37, %v1000_v31  ;;  %v403_v26 = vld [vmem:[%s1810_s2 + $0x70] sm:$0xff]  ;;  %v396_v31 = vld [vmem:[%s1810_s2 + $0x38] sm:$0xff] }
 0x169   : > { %v1024_v39 = vpop.f32.mrf.mxu1  ;;  %v1003_v44 = vpop.f32.mrf.mxu0  ;;  %v600_v48 = vmul.f32 %v1518_v40, %v1518_v40 }
 0x16a   : > { %v1520_v42 = vadd.f32 %v1023_v34, %v399_v38  ;;  %v1527_v46 = vadd.f32 %v1002_v41, %v392_v43 }
 0x16b   : > { %v1025_v45 = vpop.f32.mrf.mxu1  ;;  %v1004_v49 = vpop.f32.mrf.mxu0 }
 0x16c   : > { %616 = vadd.xlane.f32.xlu0 %v599_v29  ;;  %630 = vadd.xlane.f32.xlu1 %v606_v30  ;;  %v1026_v47 = vadd.f32 %v1025_v45, %v1024_v39  ;;  %v1005_v52 = vadd.f32 %v1004_v49, %v1003_v44  ;;  %v608_v54 = vmul.f32 %v1520_v42, %v1520_v42 }
 0x16d   : > { %v1027_v51 = vpop.f32.mrf.mxu1  ;;  %v1006_v56 = vpop.f32.mrf.mxu0  ;;  %v601_v60 = vmul.f32 %v1527_v46, %v1527_v46 }
 0x16e   : > { %v1535_v53 = vadd.f32 %v1026_v47, %v400_v50  ;;  %v1543_v58 = vadd.f32 %v1005_v52, %v393_v55 }
 0x16f   : > { %v1028_v57 = vpop.f32.mrf.mxu1  ;;  %v1007_v61 = vpop.f32.mrf.mxu0 }
 0x170   : > { %632 = vadd.xlane.f32.xlu0 %v607_v35  ;;  %552 = vadd.xlane.f32.xlu1 %v1498_v24  ;;  %v1029_v59 = vadd.f32 %v1028_v57, %v1027_v51  ;;  %v1008_v0 = vadd.f32 %v1007_v61, %v1006_v56  ;;  %v609_v2 = vmul.f32 %v1535_v53, %v1535_v53 }
 0x171   : > { %v1030_v63 = vpop.f32.mrf.mxu1  ;;  %v1009_v4 = vpop.f32.mrf.mxu0  ;;  %v602_v8 = vmul.f32 %v1543_v58, %v1543_v58 }
 0x172   : > { %v1551_v1 = vadd.f32 %v1029_v59, %v401_v62  ;;  %v1559_v6 = vadd.f32 %v1008_v0, %v394_v3 }
 0x173   : > { %v1031_v5 = vpop.f32.mrf.mxu1  ;;  %v1010_v9 = vpop.f32.mrf.mxu0 }
 0x174   : > { %570 = vadd.xlane.f32.xlu1 %v1520_v42  ;;  %554 = vadd.xlane.f32.xlu0 %v1518_v40  ;;  %v1032_v7 = vadd.f32 %v1031_v5, %v1030_v63  ;;  %v1011_v13 = vadd.f32 %v1010_v9, %v1009_v4  ;;  %v610_v15 = vmul.f32 %v1551_v1, %v1551_v1 }
 0x175   : > { %v1033_v12 = vpop.f32.mrf.mxu1  ;;  %v1012_v17 = vpop.f32.mrf.mxu0  ;;  %v603_v22 = vmul.f32 %v1559_v6, %v1559_v6 }
 0x176   : > { %v1567_v14 = vadd.f32 %v1032_v7, %v402_v10  ;;  %v1575_v20 = vadd.f32 %v1011_v13, %v395_v16 }
 0x177   : > { %v1034_v19 = vpop.f32.mrf.mxu1  ;;  %v1013_v23 = vpop.f32.mrf.mxu0 }
 0x178   : > { %618 = vadd.xlane.f32.xlu1 %v600_v48  ;;  %556 = vadd.xlane.f32.xlu0 %v1527_v46  ;;  %v1035_v21 = vadd.f32 %v1034_v19, %v1033_v12  ;;  %v1014_v28 = vadd.f32 %v1013_v23, %v1012_v17  ;;  %v611_v30 = vmul.f32 %v1567_v14, %v1567_v14 }
 0x179   : > { %v1036_v27 = vpop.f32.mrf.mxu1  ;;  %v604_v35 = vmul.f32 %v1575_v20, %v1575_v20 }
 0x17a   : > { %v1583_v29 = vadd.f32 %v1035_v21, %v403_v26  ;;  %v1591_v33 = vadd.f32 %v1014_v28, %v396_v31 }
 0x17b   : > { %v1037_v32 = vpop.f32.mrf.mxu1 }
 0x17c   : > { %634 = vadd.xlane.f32.xlu1 %v608_v54  ;;  %572 = vadd.xlane.f32.xlu0 %v1535_v53  ;;  %v1038_v34 = vadd.f32 %v1037_v32, %v1036_v27  ;;  %v612_v38 = vmul.f32 %v1583_v29, %v1583_v29  ;;  %v605_v39 = vmul.f32 %v1591_v33, %v1591_v33 }
 0x17e   : > { %v1599_v37 = vadd.f32 %v1038_v34, %v404_v36 }
 0x180   : > { %620 = vadd.xlane.f32.xlu0 %v601_v60  ;;  %558 = vadd.xlane.f32.xlu1 %v1543_v58  ;;  %v613_v41 = vmul.f32 %v1599_v37, %v1599_v37 }
 0x184   : > { %636 = vadd.xlane.f32.xlu0 %v609_v2  ;;  %574 = vadd.xlane.f32.xlu1 %v1551_v1 }
 0x188   : > { %622 = vadd.xlane.f32.xlu1 %v602_v8  ;;  %560 = vadd.xlane.f32.xlu0 %v1559_v6 }
 0x18c   : > { %638 = vadd.xlane.f32.xlu1 %v610_v15  ;;  %576 = vadd.xlane.f32.xlu0 %v1567_v14 }
 0x190   : > { %624 = vadd.xlane.f32.xlu0 %v603_v22  ;;  %562 = vadd.xlane.f32.xlu1 %v1575_v20 }
 0x194   : > { %640 = vadd.xlane.f32.xlu0 %v611_v30  ;;  %578 = vadd.xlane.f32.xlu1 %v1583_v29 }
 0x198   : > { %626 = vadd.xlane.f32.xlu1 %v604_v35  ;;  %564 = vadd.xlane.f32.xlu0 %v1591_v33 }
 0x19c   : > { %642 = vadd.xlane.f32.xlu1 %v612_v38  ;;  %580 = vadd.xlane.f32.xlu0 %v1599_v37 }
 0x1a0   : > { %628 = vadd.xlane.f32.xlu0 %v605_v39 }
 0x1a4   : > { %644 = vadd.xlane.f32.xlu0 %v613_v41 }
 0x1e9   : > { %v551_v43 = vpop.xlane.xlu0 %550 }
 0x1ea   : > { %v582_v45 = vmul.f32 0.0078125, %v551_v43  ;;  %v1633_v43 = vld [vmem:[%s1811_s3] ss:$0 sm:$0xff] }
 0x1ec   : > { %v662_v49 = vmul.f32 %v582_v45, %v582_v45  ;;  %v710_v35 = vsub.f32 %v1483_v11, %v582_v45  ;;  %v1642_v11 = vld [vmem:[%s1812_s4] ss:$0 sm:$0xff] }
 0x1ed   : > { %v567_v44 = vpop.xlane.xlu1 %566 }
 0x1ee   : > { %v1608_v50 = vmul.f32 0.0078125, %v567_v44 }
 0x1f0   : > { %v670_v57 = vmul.f32 %v1608_v50, %v1608_v50 }
 0x1f1   : > { %v615_v47 = vpop.xlane.xlu1 %614  ;;  %v569_v48 = vpop.xlane.xlu0 %568 }
 0x1f2   : > { %v646_v51 = vmul.f32 0.0078125, %v615_v47  ;;  %v1610_v54 = vmul.f32 0.0078125, %v569_v48 }
 0x1f4   : > { %v678_v52 = vsub.f32 %v646_v51, %v662_v49  ;;  %v671_v63 = vmul.f32 %v1610_v54, %v1610_v54 }
 0x1f5   : > { %v631_v55 = vpop.xlane.xlu1 %630  ;;  %v617_v56 = vpop.xlane.xlu0 %616 }
 0x1f6   : > { %v694_v59 = vmax.f32 %v678_v52, 0.0  ;;  %v654_v60 = vmul.f32 0.0078125, %v631_v55  ;;  %v647_v8 = vmul.f32 0.0078125, %v617_v56  ;;  %v718_v52 = vsub.f32 %v1489_v18, %v1608_v50 }
 0x1f7   : > { %v719_v50 = vsub.f32 %v1500_v25, %v1610_v54 }
 0x1f8   : > { %v726_v61 = vadd.f32 1e-05, %v694_v59  ;;  %v686_v62 = vsub.f32 %v654_v60, %v670_v57 }
 0x1f9   : > { %v553_v0 = vpop.xlane.xlu1 %552  ;;  %v633_v2 = vpop.xlane.xlu0 %632 }
 0x1fa   : > { %1116 = vrsqrt.f32 %v726_v61  ;;  %v702_v3 = vmax.f32 %v686_v62, 0.0  ;;  %v1616_v4 = vmul.f32 0.0078125, %v553_v0  ;;  %v655_v5 = vmul.f32 0.0078125, %v633_v2 }
 0x1fc   : > { %v734_v7 = vadd.f32 1e-05, %v702_v3  ;;  %v663_v9 = vmul.f32 %v1616_v4, %v1616_v4  ;;  %v687_v10 = vsub.f32 %v655_v5, %v671_v63 }
 0x1fd   : > { %v571_v12 = vpop.xlane.xlu1 %570  ;;  %v555_v13 = vpop.xlane.xlu0 %554 }
 0x1fe   : > { %1118 = vrsqrt.f32 %v734_v7  ;;  %v679_v15 = vsub.f32 %v647_v8, %v663_v9  ;;  %v703_v16 = vmax.f32 %v687_v10, 0.0  ;;  %v1620_v17 = vmul.f32 0.0078125, %v555_v13 }
 0x1ff   : > { %v1622_v22 = vmul.f32 0.0078125, %v571_v12 }
 0x200   : > { %v695_v19 = vmax.f32 %v679_v15, 0.0  ;;  %v735_v21 = vadd.f32 1e-05, %v703_v16  ;;  %v664_v28 = vmul.f32 %v1620_v17, %v1620_v17  ;;  %v711_v15 = vsub.f32 %v1498_v24, %v1616_v4 }
 0x201   : > { %v619_v23 = vpop.xlane.xlu1 %618  ;;  %v557_v26 = vpop.xlane.xlu0 %556  ;;  %v672_v36 = vmul.f32 %v1622_v22, %v1622_v22 }
 0x202   : > { %v727_v27 = vadd.f32 1e-05, %v695_v19  ;;  %1120 = vrsqrt.f32 %v735_v21  ;;  %v648_v30 = vmul.f32 0.0078125, %v619_v23  ;;  %v1635_v44 = vmul.f32 0.0078125, %v557_v26 }
 0x204   : > { %1122 = vrsqrt.f32 %v727_v27  ;;  %v680_v31 = vsub.f32 %v648_v30, %v664_v28  ;;  %v665_v59 = vmul.f32 %v1635_v44, %v1635_v44 }
 0x205   : > { %v635_v32 = vpop.xlane.xlu1 %634  ;;  %v573_v34 = vpop.xlane.xlu0 %572 }
 0x206   : > { %v696_v38 = vmax.f32 %v680_v31, 0.0  ;;  %v656_v39 = vmul.f32 0.0078125, %v635_v32  ;;  %v1649_v60 = vmul.f32 0.0078125, %v573_v34 }
 0x207   : > { %v1117_v41 = vpop.eup %1116 }
 0x208   : > { %v758_v47 = vmul.f32 %v1117_v41, %v710_v35  ;;  %v728_v48 = vadd.f32 1e-05, %v696_v38  ;;  %v688_v49 = vsub.f32 %v656_v39, %v672_v36  ;;  %v673_v10 = vmul.f32 %v1649_v60, %v1649_v60 }
 0x209   : > { %v559_v45 = vpop.xlane.xlu1 %558  ;;  %v621_v51 = vpop.xlane.xlu0 %620  ;;  %v712_v35 = vsub.f32 %v1518_v40, %v1620_v17 }
 0x20a   : > { %v781_v55 = vmul.f32 %v1633_v43, %v758_v47  ;;  %1124 = vrsqrt.f32 %v728_v48  ;;  %v704_v56 = vmax.f32 %v688_v49, 0.0  ;;  %v649_v61 = vmul.f32 0.0078125, %v621_v51 }
 0x20b   : > { %v1119_v57 = vpop.eup %1118  ;;  %v1652_v2 = vmul.f32 0.0078125, %v559_v45 }
 0x20c   : > { %v804_v62 = vadd.f32 %v1642_v11, %v781_v55  ;;  %v766_v63 = vmul.f32 %v1119_v57, %v718_v52  ;;  %v736_v0 = vadd.f32 1e-05, %v704_v56  ;;  %v681_v3 = vsub.f32 %v649_v61, %v665_v59 }
 0x20d   : > { %v575_v5 = vpop.xlane.xlu1 %574  ;;  %v637_v18 = vpop.xlane.xlu0 %636  ;;  %v666_v25 = vmul.f32 %v1652_v2, %v1652_v2  ;;  %v720_v59 = vsub.f32 %v1520_v42, %v1622_v22 }
 0x20e   : > { %820 = vst [vmem:[%s1654_s23] sm:$0xff] %v804_v62  ;;  %v789_v7 = vmul.f32 %v1633_v43, %v766_v63  ;;  %1126 = vrsqrt.f32 %v736_v0  ;;  %v657_v8 = vmul.f32 0.0078125, %v637_v18  ;;  %v697_v12 = vmax.f32 %v681_v3, 0.0 }
 0x20f   : > { %v1121_v9 = vpop.eup %1120  ;;  %v1669_v30 = vmul.f32 0.0078125, %v575_v5 }
 0x210   : > { %v812_v13 = vadd.f32 %v1642_v11, %v789_v7  ;;  %v767_v16 = vmul.f32 %v1121_v9, %v719_v50  ;;  %v729_v54 = vadd.f32 1e-05, %v697_v12  ;;  %v689_v21 = vsub.f32 %v657_v8, %v673_v10 }
 0x211   : > { %v1123_v19 = vpop.eup %1122  ;;  %v623_v23 = vpop.xlane.xlu1 %622  ;;  %v674_v47 = vmul.f32 %v1669_v30, %v1669_v30 }
 0x212   : > { %v561_v26 = vpop.xlane.xlu0 %560  ;;  %828 = vst [vmem:[%s1654_s23 + $0x40] sm:$0xff] %v812_v13  ;;  %v759_v27 = vmul.f32 %v1123_v19, %v711_v15  ;;  %v790_v28 = vmul.f32 %v1633_v43, %v767_v16  ;;  %v650_v31 = vmul.f32 0.0078125, %v623_v23  ;;  %1128 = vrsqrt.f32 %v729_v54 }
 0x213   : > { %v705_v32 = vmax.f32 %v689_v21, 0.0  ;;  %v1679_v51 = vmul.f32 0.0078125, %v561_v26  ;;  %v713_v13 = vsub.f32 %v1527_v46, %v1635_v44  ;;  %v721_v46 = vsub.f32 %v1535_v53, %v1649_v60 }
 0x214   : > { %v782_v24 = vmul.f32 %v1633_v43, %v759_v27  ;;  %v813_v4 = vadd.f32 %v1642_v11, %v790_v28  ;;  %v682_v34 = vsub.f32 %v650_v31, %v666_v25 }
 0x215   : > { %v737_v36 = vadd.f32 1e-05, %v705_v32  ;;  %v639_v38 = vpop.xlane.xlu1 %638  ;;  %v667_v0 = vmul.f32 %v1679_v51, %v1679_v51 }
 0x216   : > { %v577_v39 = vpop.xlane.xlu0 %576  ;;  %v805_v41 = vadd.f32 %v1642_v11, %v782_v24  ;;  %829 = vst [vmem:[%s1654_s23 + $0x48] sm:$0xff] %v813_v4  ;;  %v698_v48 = vmax.f32 %v682_v34, 0.0  ;;  %v658_v49 = vmul.f32 0.0078125, %v639_v38 }
 0x217   : > { %v1125_v45 = vpop.eup %1124  ;;  %1130 = vrsqrt.f32 %v737_v36  ;;  %v1682_v40 = vmul.f32 0.0078125, %v577_v39 }
 0x218   : > { %821 = vst [vmem:[%s1654_s23 + $0x8] sm:$0xff] %v805_v41  ;;  %v760_v52 = vmul.f32 %v1125_v45, %v712_v35  ;;  %v730_v55 = vadd.f32 1e-05, %v698_v48  ;;  %v690_v56 = vsub.f32 %v658_v49, %v674_v47  ;;  %v714_v35 = vsub.f32 %v1543_v58, %v1652_v2 }
 0x219   : > { %v563_v17 = vpop.xlane.xlu1 %562  ;;  %v675_v7 = vmul.f32 %v1682_v40, %v1682_v40 }
 0x21a   : > { %v625_v57 = vpop.xlane.xlu0 %624  ;;  %v783_v61 = vmul.f32 %v1633_v43, %v760_v52  ;;  %1132 = vrsqrt.f32 %v730_v55  ;;  %v706_v62 = vmax.f32 %v690_v56, 0.0  ;;  %v1694_v10 = vmul.f32 0.0078125, %v563_v17 }
 0x21b   : > { %v1127_v63 = vpop.eup %1126  ;;  %v651_v3 = vmul.f32 0.0078125, %v625_v57  ;;  %v722_v55 = vsub.f32 %v1551_v1, %v1669_v30 }
 0x21c   : > { %v806_v5 = vadd.f32 %v1642_v11, %v783_v61  ;;  %v768_v18 = vmul.f32 %v1127_v63, %v720_v59  ;;  %v738_v50 = vadd.f32 1e-05, %v706_v62  ;;  %v668_v27 = vmul.f32 %v1694_v10, %v1694_v10 }
 0x21d   : > { %v683_v8 = vsub.f32 %v651_v3, %v667_v0  ;;  %v579_v9 = vpop.xlane.xlu1 %578 }
 0x21e   : > { %v641_v42 = vpop.xlane.xlu0 %640  ;;  %822 = vst [vmem:[%s1654_s23 + $0x10] sm:$0xff] %v806_v5  ;;  %v791_v22 = vmul.f32 %v1633_v43, %v768_v18  ;;  %1134 = vrsqrt.f32 %v738_v50  ;;  %v1702_v28 = vmul.f32 0.0078125, %v579_v9 }
 0x21f   : > { %v659_v12 = vmul.f32 0.0078125, %v641_v42  ;;  %v699_v15 = vmax.f32 %v683_v8, 0.0  ;;  %v1129_v16 = vpop.eup %1128  ;;  %v715_v42 = vsub.f32 %v1559_v6, %v1679_v51 }
 0x220   : > { %v814_v19 = vadd.f32 %v1642_v11, %v791_v22  ;;  %v761_v54 = vmul.f32 %v1129_v16, %v713_v13  ;;  %v676_v53 = vmul.f32 %v1702_v28, %v1702_v28 }
 0x221   : > { %v691_v25 = vsub.f32 %v659_v12, %v675_v7  ;;  %v731_v21 = vadd.f32 1e-05, %v699_v15  ;;  %v627_v23 = vpop.xlane.xlu1 %626 }
 0x222   : > { %v565_v26 = vpop.xlane.xlu0 %564  ;;  %830 = vst [vmem:[%s1654_s23 + $0x50] sm:$0xff] %v814_v19  ;;  %v652_v32 = vmul.f32 0.0078125, %v627_v23  ;;  %v784_v44 = vmul.f32 %v1633_v43, %v761_v54  ;;  %v723_v19 = vsub.f32 %v1567_v14, %v1682_v40 }
 0x223   : > { %v707_v31 = vmax.f32 %v691_v25, 0.0  ;;  %1136 = vrsqrt.f32 %v731_v21  ;;  %v1710_v39 = vmul.f32 0.0078125, %v565_v26  ;;  %v716_v26 = vsub.f32 %v1575_v20, %v1694_v10 }
 0x224   : > { %v1131_v24 = vpop.eup %1130  ;;  %v684_v34 = vsub.f32 %v652_v32, %v668_v27  ;;  %v807_v36 = vadd.f32 %v1642_v11, %v784_v44  ;;  %v724_v32 = vsub.f32 %v1583_v29, %v1702_v28 }
 0x225   : > { %v739_v4 = vadd.f32 1e-05, %v707_v31  ;;  %v769_v38 = vmul.f32 %v1131_v24, %v721_v46  ;;  %v643_v41 = vpop.xlane.xlu1 %642  ;;  %v669_v17 = vmul.f32 %v1710_v39, %v1710_v39  ;;  %v717_v24 = vsub.f32 %v1591_v33, %v1710_v39 }
 0x226   : > { %v581_v47 = vpop.xlane.xlu0 %580  ;;  %v700_v60 = vmax.f32 %v684_v34, 0.0  ;;  %v660_v48 = vmul.f32 0.0078125, %v643_v41  ;;  %823 = vst [vmem:[%s1654_s23 + $0x18] sm:$0xff] %v807_v36 }
 0x227   : > { %1138 = vrsqrt.f32 %v739_v4  ;;  %v1133_v49 = vpop.eup %1132  ;;  %v792_v45 = vmul.f32 %v1633_v43, %v769_v38  ;;  %v597_v57 = vmul.f32 0.0078125, %v581_v47 }
 0x228   : > { %v762_v52 = vmul.f32 %v1133_v49, %v714_v35  ;;  %v732_v58 = vadd.f32 1e-05, %v700_v60  ;;  %v692_v2 = vsub.f32 %v660_v48, %v676_v53 }
 0x229   : > { %v815_v56 = vadd.f32 %v1642_v11, %v792_v45  ;;  %v677_v18 = vmul.f32 %v597_v57, %v597_v57  ;;  %v725_v35 = vsub.f32 %v1599_v37, %v597_v57 }
 0x22a   : > { %v629_v59 = vpop.xlane.xlu0 %628  ;;  %v785_v61 = vmul.f32 %v1633_v43, %v762_v52  ;;  %1140 = vrsqrt.f32 %v732_v58  ;;  %v708_v62 = vmax.f32 %v692_v2, 0.0 }
 0x22b   : > { %v653_v63 = vmul.f32 0.0078125, %v629_v59  ;;  %v1135_v0 = vpop.eup %1134  ;;  %831 = vst [vmem:[%s1654_s23 + $0x58] sm:$0xff] %v815_v56 }
 0x22c   : > { %v808_v3 = vadd.f32 %v1642_v11, %v785_v61  ;;  %v770_v5 = vmul.f32 %v1135_v0, %v722_v55  ;;  %v740_v1 = vadd.f32 1e-05, %v708_v62 }
 0x22d   : > { %v685_v30 = vsub.f32 %v653_v63, %v669_v17 }
 0x22e   : > { %v645_v50 = vpop.xlane.xlu0 %644  ;;  %824 = vst [vmem:[%s1654_s23 + $0x20] sm:$0xff] %v808_v3  ;;  %v793_v7 = vmul.f32 %v1633_v43, %v770_v5  ;;  %1142 = vrsqrt.f32 %v740_v1 }
 0x22f   : > { %v701_v8 = vmax.f32 %v685_v30, 0.0  ;;  %v661_v9 = vmul.f32 0.0078125, %v645_v50 }
 0x230   : > { %v1137_v22 = vpop.eup %1136  ;;  %v816_v12 = vadd.f32 %v1642_v11, %v793_v7 }
 0x231   : > { %v733_v13 = vadd.f32 1e-05, %v701_v8  ;;  %v693_v15 = vsub.f32 %v661_v9, %v677_v18  ;;  %v763_v16 = vmul.f32 %v1137_v22, %v715_v42 }
 0x232   : > { %832 = vst [vmem:[%s1654_s23 + $0x60] sm:$0xff] %v816_v12 }
 0x233   : > { %1144 = vrsqrt.f32 %v733_v13  ;;  %v709_v25 = vmax.f32 %v693_v15, 0.0  ;;  %v786_v21 = vmul.f32 %v1633_v43, %v763_v16 }
 0x234   : > { %v1139_v54 = vpop.eup %1138 }
 0x235   : > { %v771_v23 = vmul.f32 %v1139_v54, %v723_v19  ;;  %v741_v6 = vadd.f32 1e-05, %v709_v25  ;;  %v809_v51 = vadd.f32 %v1642_v11, %v786_v21 }
 0x237   : > { %v794_v27 = vmul.f32 %v1633_v43, %v771_v23  ;;  %1146 = vrsqrt.f32 %v741_v6  ;;  %v1141_v31 = vpop.eup %1140  ;;  %825 = vst [vmem:[%s1654_s23 + $0x28] sm:$0xff] %v809_v51 }
 0x238   : > { %v764_v40 = vmul.f32 %v1141_v31, %v716_v26 }
 0x239   : > { %v817_v14 = vadd.f32 %v1642_v11, %v794_v27 }
 0x23a   : > { %v787_v46 = vmul.f32 %v1633_v43, %v764_v40 }
 0x23b   : > { %833 = vst [vmem:[%s1654_s23 + $0x68] sm:$0xff] %v817_v14  ;;  %v1143_v44 = vpop.eup %1142 }
 0x23c   : > { %v810_v20 = vadd.f32 %v1642_v11, %v787_v46  ;;  %v772_v10 = vmul.f32 %v1143_v44, %v724_v32 }
 0x23e   : > { %826 = vst [vmem:[%s1654_s23 + $0x30] sm:$0xff] %v810_v20  ;;  %v795_v4 = vmul.f32 %v1633_v43, %v772_v10 }
 0x240   : > { %v1145_v34 = vpop.eup %1144  ;;  %v818_v29 = vadd.f32 %v1642_v11, %v795_v4 }
 0x241   : > { %v765_v28 = vmul.f32 %v1145_v34, %v717_v24 }
 0x242   : > { %834 = vst [vmem:[%s1654_s23 + $0x70] sm:$0xff] %v818_v29 }
 0x243   : > { %v788_v36 = vmul.f32 %v1633_v43, %v765_v28 }
 0x244   : > { %v1147_v38 = vpop.eup %1146 }
 0x245   : > { %v811_v41 = vadd.f32 %v1642_v11, %v788_v36  ;;  %v773_v47 = vmul.f32 %v1147_v38, %v725_v35 }
 0x247   : > { %827 = vst [vmem:[%s1654_s23 + $0x38] sm:$0xff] %v811_v41  ;;  %v796_v33 = vmul.f32 %v1633_v43, %v773_v47 }
 0x249   : > { %v819_v37 = vadd.f32 %v1642_v11, %v796_v33 }
 0x24b   : > { %835 = vst [vmem:[%s1654_s23 + $0x78] sm:$0xff] %v819_v37 }
 0x24c   : > { %1161 = shalt.err (!%p1158_p3)
}
 0x24d   : > { %s1162_s12 = scalar_lea.hbm %s1760_s30, 2048  ;;  %s1166_s15 = scalar_lea.hbm %s1813_s5, 4096 }
 0x24e   : > { %p1163_p4 = scmp.ne.s32.totalorder %s1760_s30, %s1162_s12  ;;  %p1167_p9 = scmp.lt.s32.totalorder %s1760_s30, %s1813_s5 }
 0x24f   : > { %p1168_p10 = scmp.lt.s32.totalorder %s1166_s15, %s1162_s12 }
 0x250   : > { %p1164_p7 = pnand %p1163_p4, %p1283_p5 }
 0x251   : > { %p1169_p11 = por %p1168_p10, %p1167_p9 }
 0x252   : > { %p1165_p8 = pneg %p1164_p7 }
 0x254   : > { %p1170_p12 = pnand %p1169_p11, %p1165_p8 }
 0x256   : > { %1173 = shalt.err (!%p1170_p12)
}
 0x257   : > { %s1213_s23 = smov 128   ;;  %s1214_s25 = smov 8  }
 0x258   : > { %1071 = dma.vmem_to_hbm [thread:$0]  (%p1283_p5), %s1762_s26, 2048, %s1760_s30, %s1768_s6, %s1213_s23, %s1213_s23, %s1214_s25  }
 0x259 PF: > { %p1077_p13 = scmp.ge.s32.totalorder %s1208_s21, 2  ;;  %s865_s7 = sand.u32 1, %s1196_s18  }
 0x25a   : > { %s866_s8 = scalar_lea.sflag [#allocation3], %s865_s7 }
 0x25b   : > { %p1074_p0 = pnand %p1077_p13, %p1287_p6 }
 0x25d   : > { %p1075_p1 = pneg %p1074_p0 }
 0x25f   : > { %1191 = dma.done.wait (%p1075_p1), %s866_s8, 2048  }
 0x260   : > { %1193 = vsyncadd (%p1075_p1), %s866_s8, 4294965248  ;;  %p15_p2 = scmp.ge.s32.totalorder %s1270_s24, 4   ;;  %s1816_s18 = smov %s1200_s19 }
 0x261   : > { %s1817_s19 = smov %s1204_s20  ;;  %s1818_s20 = smov %s1281_s27 }
 0x262   : > { %s1819_s21 = smov %s1270_s24  ;;  %17 = sbr.rel (!%p15_p2) target bundleno = 3 (0x3), region = 75 }
 0x267   :  { %871 = vsyncpa [#allocation3], 1 }
 0x268   :  { %873 = vsyncpa [#allocation3 + $0x1], 1 }

</bundles_post_ra>
